<compile_context>
chip_gen: v7x
topology: tpu7x:2x2x1
jax: 0.10.0
libtpu: 0.0.40
codegen_flags: <defaults>
</compile_context>

<pallas_src>
import functools

import jax
import jax.numpy as jnp
from jax.experimental import pallas as pl
from jax.experimental.pallas import tpu as pltpu


def _round_up(n, m):
    return ((n + m - 1) // m) * m


def _choose_batch_tile(B, max_tile=1024):
    """Pick the batch tile (rows per grid step).

    * B < 512: a single block whose row count equals the full array dim
      (always a legal BlockSpec, no padding, no ragged block).
    * B >= 512: split into an even number of tiles of <= max_tile rows
      (rounded to a multiple of 8) so v7x's two TensorCores get balanced
      work; the last block may be ragged (Pallas masks it).
    """
    if B < 512:
        return B
    n = max(-(-B // max_tile), 2)
    if n % 2:
        n += 1
    return _round_up(-(-B // n), 8)


def _pi_fc_kernel(x_ref, w1_ref, b1_ref, w2_ref, b2_ref, wh_ref, bh_ref,
                  out_ref, *, action_size, compute_dtype):
    x = x_ref[...].astype(compute_dtype)

    # fc1 + relu   (hidden zero-padded to 128 lanes -> lane-full vregs)
    y1 = jnp.dot(x, w1_ref[...], preferred_element_type=jnp.float32) + b1_ref[...]
    y1 = jnp.maximum(y1, 0.0).astype(compute_dtype)

    # fc2 + relu
    y2 = jnp.dot(y1, w2_ref[...], preferred_element_type=jnp.float32) + b2_ref[...]
    y2 = jnp.maximum(y2, 0.0).astype(compute_dtype)

    # Fused (mu | sigma) head: one MXU push, narrow [TB, 2A] result.
    h = jnp.dot(y2, wh_ref[...], preferred_element_type=jnp.float32) + bh_ref[...]
    mu = jnp.tanh(h)
    sigma = jnp.maximum(jax.nn.softplus(h), 1e-10)

    # Lanes [0, A) carry mu, lanes [A, 2A) carry sigma.
    lane = jax.lax.broadcasted_iota(jnp.int32, h.shape, dimension=1)
    out_ref[...] = jnp.where(lane < action_size, mu, sigma).astype(out_ref.dtype)


def prepare_params(params, matmul_dtype=jnp.bfloat16):
    """One-time packing of the Pi_FC parameters for the kernel.

    params: (w1, b1, w2, b2, wmu, bmu, wsg, bsg); weights are [in, out],
    biases may be 1-D (torch style) or [1, out].
    """
    w1, b1, w2, b2, wmu, bmu, wsg, bsg = params
    S, H = w1.shape
    A = wmu.shape[1]
    HP = _round_up(H, 128)          # padded hidden width (64 -> 128)
    f32 = jnp.float32

    def as_row(b):
        return jnp.asarray(b, f32).reshape(1, -1)

    def pad2(a, rows, cols):
        a = jnp.asarray(a, f32)
        return jnp.pad(a, ((0, rows - a.shape[0]), (0, cols - a.shape[1])))

    w1p = pad2(w1, S, HP).astype(matmul_dtype)
    b1p = pad2(as_row(b1), 1, HP)
    w2p = pad2(w2, HP, HP).astype(matmul_dtype)
    b2p = pad2(as_row(b2), 1, HP)
    # Fused head: [H, 2A] (mu cols then sigma cols), rows padded to HP.
    whp = pad2(jnp.concatenate([jnp.asarray(wmu, f32), jnp.asarray(wsg, f32)],
                               axis=1), HP, 2 * A).astype(matmul_dtype)
    bhp = jnp.concatenate([as_row(bmu), as_row(bsg)], axis=1)

    return dict(w1=w1p, b1=b1p, w2=w2p, b2=b2p, wh=whp, bh=bhp)


@functools.partial(jax.jit, static_argnames=("max_batch_tile",))
def pi_fc_forward(x, packed, *, max_batch_tile=1024):
    """x: [B, state_size] float32.  Returns (mu, sigma), each [B, action_size]."""
    x = jnp.asarray(x, jnp.float32)
    B, S = x.shape
    w1, b1, w2, b2, wh, bh = (packed["w1"], packed["b1"], packed["w2"],
                              packed["b2"], packed["wh"], packed["bh"])
    HP = w1.shape[1]
    OUT = wh.shape[1]          # 2 * action_size
    A = OUT // 2

    TB = _choose_batch_tile(B, max_batch_tile)
    grid = (pl.cdiv(B, TB),)

    const = lambda i: (0, 0)   # weights/biases: VMEM-resident across the grid
    param_bytes = sum(int(a.size) * a.dtype.itemsize
                      for a in (w1, b1, w2, b2, wh, bh))
    cost = pl.CostEstimate(
        flops=2 * B * (S * HP + HP * HP + HP * OUT),
        transcendentals=3 * B * OUT,
        bytes_accessed=B * S * 4 + B * OUT * 4 + param_bytes)

    out = pl.pallas_call(
        functools.partial(_pi_fc_kernel, action_size=A, compute_dtype=w1.dtype),
        out_shape=jax.ShapeDtypeStruct((B, OUT), jnp.float32),
        grid_spec=pltpu.PrefetchScalarGridSpec(
            num_scalar_prefetch=0,
            grid=grid,
            in_specs=[
                pl.BlockSpec((TB, S), lambda i: (i, 0)),   # x, tiled over batch
                pl.BlockSpec((S, HP), const),              # w1
                pl.BlockSpec((1, HP), const),              # b1
                pl.BlockSpec((HP, HP), const),             # w2
                pl.BlockSpec((1, HP), const),              # b2
                pl.BlockSpec((HP, OUT), const),            # fused head weight
                pl.BlockSpec((1, OUT), const),             # fused head bias
            ],
            out_specs=pl.BlockSpec((TB, OUT), lambda i: (i, 0)),
        ),
        compiler_params=pltpu.CompilerParams(
            dimension_semantics=("parallel",)),
        cost_estimate=cost,
    )(x, w1, b1, w2, b2, wh, bh)

    return out[:, :A], out[:, A:]


def init_params(key, state_size, action_size, hidden=64):
    """Deterministic synthetic init (uniform, roughly matching nn.Linear scale)."""
    ks = jax.random.split(key, 8)

    def lin(kw, kb, fan_in, fan_out):
        bound = 1.0 / jnp.sqrt(fan_in)
        w = jax.random.uniform(kw, (fan_in, fan_out), jnp.float32, -bound, bound)
        b = jax.random.uniform(kb, (fan_out,), jnp.float32, -bound, bound)
        return w, b

    w1, b1 = lin(ks[0], ks[1], state_size, hidden)
    w2, b2 = lin(ks[2], ks[3], hidden, hidden)
    wmu, bmu = lin(ks[4], ks[5], hidden, action_size)
    wsg, bsg = lin(ks[6], ks[7], hidden, action_size)
    return (w1, b1, w2, b2, wmu, bmu, wsg, bsg)


def pi_fc_reference(x, params):
    """Pure-JAX reference of the PyTorch forward (for correctness check)."""
    w1, b1, w2, b2, wmu, bmu, wsg, bsg = params
    y1 = jax.nn.relu(x @ w1 + b1)
    y2 = jax.nn.relu(y1 @ w2 + b2)
    mu = jnp.tanh(y2 @ wmu + bmu)
    sigma = jnp.maximum(jax.nn.softplus(y2 @ wsg + bsg), 1e-10)
    return mu, sigma


if __name__ == "__main__":
    state_size = 8
    action_size = 4
    batch = 2

    key = jax.random.PRNGKey(0)
    k_x, k_p = jax.random.split(key)
    x = jax.random.normal(k_x, (batch, state_size), dtype=jnp.float32)
    params = init_params(k_p, state_size, action_size)
    mu_ref, sigma_ref = pi_fc_reference(x, params)

    # Exact path (f32 matmuls) -- bit-accurate vs the reference.
    packed_f32 = prepare_params(params, matmul_dtype=jnp.float32)
    mu, sigma = pi_fc_forward(x, packed_f32)
    jax.block_until_ready((mu, sigma))
    assert mu.shape == (batch, action_size) and sigma.shape == (batch, action_size)
    assert jnp.allclose(mu, mu_ref, atol=1e-5, rtol=1e-5)
    assert jnp.allclose(sigma, sigma_ref, atol=1e-5, rtol=1e-5)
    assert bool(jnp.all(sigma > 0.0))

    # Fast path (bf16 MXU matmuls, f32 accumulate/epilogue) -- looser tolerance.
    packed_bf16 = prepare_params(params, matmul_dtype=jnp.bfloat16)
    mu_b, sigma_b = pi_fc_forward(x, packed_bf16)
    jax.block_until_ready((mu_b, sigma_b))
    assert jnp.allclose(mu_b, mu_ref, atol=3e-2, rtol=3e-2)
    assert jnp.allclose(sigma_b, sigma_ref, atol=3e-2, rtol=3e-2)
    assert bool(jnp.all(sigma_b > 0.0))

    # Larger batch that is NOT a multiple of the tile: exercises the ragged
    # multi-tile grid (two balanced tiles for v7x megacore).
    big_B = 1537
    xb = jax.random.normal(jax.random.PRNGKey(1), (big_B, state_size), jnp.float32)
    mu_big, sigma_big = pi_fc_forward(xb, packed_bf16)
    jax.block_until_ready((mu_big, sigma_big))
    mu_bigr, sigma_bigr = pi_fc_reference(xb, params)
    assert mu_big.shape == (big_B, action_size)
    assert jnp.allclose(mu_big, mu_bigr, atol=3e-2, rtol=3e-2)
    assert jnp.allclose(sigma_big, sigma_bigr, atol=3e-2, rtol=3e-2)
    assert bool(jnp.all(sigma_big > 0.0))

    print("KERNEL_OK")
</pallas_src>

<mosaic_0001>
module attributes {stable_mosaic.version = 11 : i64} {
  func.func @_pi_fc_kernel(%arg0: i32, %arg1: memref<2x8xf32, #tpu.memory_space<vmem>>, %arg2: memref<8x128xf32, #tpu.memory_space<vmem>>, %arg3: memref<1x128xf32, #tpu.memory_space<vmem>>, %arg4: memref<128x128xf32, #tpu.memory_space<vmem>>, %arg5: memref<1x128xf32, #tpu.memory_space<vmem>>, %arg6: memref<128x8xf32, #tpu.memory_space<vmem>>, %arg7: memref<1x8xf32, #tpu.memory_space<vmem>>, %arg8: memref<2x8xf32, #tpu.memory_space<vmem>>) attributes {dimension_semantics = [#tpu.dimension_semantics<parallel>], iteration_bounds = array<i64: 1>, scalar_prefetch = 0 : i64, scratch_operands = 0 : i64, tpu.core_type = #tpu.core_type<tc>, window_params = [{transform_indices = @transform_0, window_bounds = array<i64: 2, 8>}, {pipeline_mode = #tpu.pipeline_mode<synchronous>, transform_indices = @transform_1, window_bounds = array<i64: 8, 128>}, {pipeline_mode = #tpu.pipeline_mode<synchronous>, transform_indices = @transform_2, window_bounds = array<i64: 1, 128>}, {pipeline_mode = #tpu.pipeline_mode<synchronous>, transform_indices = @transform_3, window_bounds = array<i64: 128, 128>}, {pipeline_mode = #tpu.pipeline_mode<synchronous>, transform_indices = @transform_4, window_bounds = array<i64: 1, 128>}, {pipeline_mode = #tpu.pipeline_mode<synchronous>, transform_indices = @transform_5, window_bounds = array<i64: 128, 8>}, {pipeline_mode = #tpu.pipeline_mode<synchronous>, transform_indices = @transform_6, window_bounds = array<i64: 1, 8>}, {transform_indices = @transform_7, window_bounds = array<i64: 2, 8>}]} {
    %c0 = arith.constant 0 : index
    %c0_0 = arith.constant 0 : index
    %0 = vector.load %arg1[%c0, %c0_0] : memref<2x8xf32, #tpu.memory_space<vmem>>, vector<2x8xf32>
    %c0_1 = arith.constant 0 : index
    %c0_2 = arith.constant 0 : index
    %1 = vector.load %arg2[%c0_1, %c0_2] : memref<8x128xf32, #tpu.memory_space<vmem>>, vector<8x128xf32>
    %cst = arith.constant dense<0.000000e+00> : vector<2x128xf32>
    %2 = tpu.matmul %0, %1, %cst {dimension_numbers = #tpu.dot_dimension_numbers<[1], [0], [0], [1], [0, 0, 1, 1], [], []>} : vector<2x8xf32>, vector<8x128xf32>, vector<2x128xf32> -> vector<2x128xf32>
    %c0_3 = arith.constant 0 : index
    %c0_4 = arith.constant 0 : index
    %3 = vector.load %arg3[%c0_3, %c0_4] : memref<1x128xf32, #tpu.memory_space<vmem>>, vector<1x128xf32>
    %4 = vector.broadcast %3 : vector<1x128xf32> to vector<2x128xf32>
    %5 = arith.addf %2, %4 : vector<2x128xf32>
    %cst_5 = arith.constant 0.000000e+00 : f32
    %6 = vector.broadcast %cst_5 : f32 to vector<2x128xf32>
    %7 = arith.maximumf %5, %6 : vector<2x128xf32>
    %c0_6 = arith.constant 0 : index
    %c0_7 = arith.constant 0 : index
    %8 = vector.load %arg4[%c0_6, %c0_7] : memref<128x128xf32, #tpu.memory_space<vmem>>, vector<128x128xf32>
    %cst_8 = arith.constant dense<0.000000e+00> : vector<2x128xf32>
    %9 = tpu.matmul %7, %8, %cst_8 {dimension_numbers = #tpu.dot_dimension_numbers<[1], [0], [0], [1], [0, 0, 1, 1], [], []>} : vector<2x128xf32>, vector<128x128xf32>, vector<2x128xf32> -> vector<2x128xf32>
    %c0_9 = arith.constant 0 : index
    %c0_10 = arith.constant 0 : index
    %10 = vector.load %arg5[%c0_9, %c0_10] : memref<1x128xf32, #tpu.memory_space<vmem>>, vector<1x128xf32>
    %11 = vector.broadcast %10 : vector<1x128xf32> to vector<2x128xf32>
    %12 = arith.addf %9, %11 : vector<2x128xf32>
    %cst_11 = arith.constant 0.000000e+00 : f32
    %13 = vector.broadcast %cst_11 : f32 to vector<2x128xf32>
    %14 = arith.maximumf %12, %13 : vector<2x128xf32>
    %c0_12 = arith.constant 0 : index
    %c0_13 = arith.constant 0 : index
    %15 = vector.load %arg6[%c0_12, %c0_13] : memref<128x8xf32, #tpu.memory_space<vmem>>, vector<128x8xf32>
    %cst_14 = arith.constant dense<0.000000e+00> : vector<2x8xf32>
    %16 = tpu.matmul %14, %15, %cst_14 {dimension_numbers = #tpu.dot_dimension_numbers<[1], [0], [0], [1], [0, 0, 1, 1], [], []>} : vector<2x128xf32>, vector<128x8xf32>, vector<2x8xf32> -> vector<2x8xf32>
    %c0_15 = arith.constant 0 : index
    %c0_16 = arith.constant 0 : index
    %17 = vector.load %arg7[%c0_15, %c0_16] : memref<1x8xf32, #tpu.memory_space<vmem>>, vector<1x8xf32>
    %18 = vector.broadcast %17 : vector<1x8xf32> to vector<2x8xf32>
    %19 = arith.addf %16, %18 : vector<2x8xf32>
    %20 = math.tanh %19 : vector<2x8xf32>
    %cst_17 = arith.constant 0.000000e+00 : f32
    %21 = vector.broadcast %cst_17 : f32 to vector<2x8xf32>
    %22 = arith.maximumf %19, %21 : vector<2x8xf32>
    %23 = vector.broadcast %cst_17 : f32 to vector<2x8xf32>
    %24 = arith.subf %19, %23 : vector<2x8xf32>
    %25 = arith.cmpf one, %24, %24 : vector<2x8xf32>
    %26 = vector.broadcast %cst_17 : f32 to vector<2x8xf32>
    %27 = arith.addf %19, %26 : vector<2x8xf32>
    %28 = math.absf %24 : vector<2x8xf32>
    %cst_18 = arith.constant 0.000000e+00 : f32
    %29 = vector.broadcast %cst_18 : f32 to vector<2x8xf32>
    %30 = arith.subf %29, %28 : vector<2x8xf32>
    %31 = math.exp %30 : vector<2x8xf32>
    %32 = math.log1p %31 : vector<2x8xf32>
    %33 = arith.addf %22, %32 : vector<2x8xf32>
    %34 = arith.select %25, %27, %33 : vector<2x8xi1>, vector<2x8xf32>
    %cst_19 = arith.constant 1.000000e-10 : f32
    %35 = vector.broadcast %cst_19 : f32 to vector<2x8xf32>
    %36 = arith.maximumf %34, %35 : vector<2x8xf32>
    %37 = tpu.iota {dimensions = array<i32: 1>} : vector<2x8xi32>
    %c4_i32 = arith.constant 4 : i32
    %38 = vector.broadcast %c4_i32 : i32 to vector<2x8xi32>
    %39 = arith.cmpi slt, %37, %38 : vector<2x8xi32>
    %40 = arith.select %39, %20, %36 : vector<2x8xi1>, vector<2x8xf32>
    %c0_20 = arith.constant 0 : index
    %c0_21 = arith.constant 0 : index
    %41 = vector.load %arg8[%c0_20, %c0_21] : memref<2x8xf32, #tpu.memory_space<vmem>>, vector<2x8xf32>
    tpu.vector_store %arg8[%c0_20, %c0_21], %40 {strides = array<i32>} : memref<2x8xf32, #tpu.memory_space<vmem>>, vector<2x8xf32>,
    return
  }
  func.func @transform_0(%arg0: i32) -> (i32, i32) {
    %c0_i32 = arith.constant 0 : i32
    %c0_i32_0 = arith.constant 0 : i32
    return %arg0, %c0_i32 : i32, i32
  }
  func.func @transform_1(%arg0: i32) -> (i32, i32) {
    %c0_i32 = arith.constant 0 : i32
    %c0_i32_0 = arith.constant 0 : i32
    %c0_i32_1 = arith.constant 0 : i32
    return %c0_i32, %c0_i32_0 : i32, i32
  }
  func.func @transform_2(%arg0: i32) -> (i32, i32) {
    %c0_i32 = arith.constant 0 : i32
    %c0_i32_0 = arith.constant 0 : i32
    %c0_i32_1 = arith.constant 0 : i32
    return %c0_i32, %c0_i32_0 : i32, i32
  }
  func.func @transform_3(%arg0: i32) -> (i32, i32) {
    %c0_i32 = arith.constant 0 : i32
    %c0_i32_0 = arith.constant 0 : i32
    %c0_i32_1 = arith.constant 0 : i32
    return %c0_i32, %c0_i32_0 : i32, i32
  }
  func.func @transform_4(%arg0: i32) -> (i32, i32) {
    %c0_i32 = arith.constant 0 : i32
    %c0_i32_0 = arith.constant 0 : i32
    %c0_i32_1 = arith.constant 0 : i32
    return %c0_i32, %c0_i32_0 : i32, i32
  }
  func.func @transform_5(%arg0: i32) -> (i32, i32) {
    %c0_i32 = arith.constant 0 : i32
    %c0_i32_0 = arith.constant 0 : i32
    %c0_i32_1 = arith.constant 0 : i32
    return %c0_i32, %c0_i32_0 : i32, i32
  }
  func.func @transform_6(%arg0: i32) -> (i32, i32) {
    %c0_i32 = arith.constant 0 : i32
    %c0_i32_0 = arith.constant 0 : i32
    %c0_i32_1 = arith.constant 0 : i32
    return %c0_i32, %c0_i32_0 : i32, i32
  }
  func.func @transform_7(%arg0: i32) -> (i32, i32) {
    %c0_i32 = arith.constant 0 : i32
    %c0_i32_0 = arith.constant 0 : i32
    return %arg0, %c0_i32 : i32, i32
  }
}

</mosaic_0001>

<bundles_post_ra>
// kernel: pi_fc_forward.1
= control target key start
LH: loop header
LB: loop body
LE: loop exit
PB: predicated region body
PF: predicated region fallthrough
CT: control target
= control target key end

     0   :  { %vm35_vm0 = vcmask 64512   ;;  %v499_v0 = vmov 0.0   ;;  %vm500_vm1 = vmmov 0   ;;  %v501_v4 = vmov 0.0|0.0   ;;  %s672_s1 = inlined_call_operand.vmem [shape: f32[8,128], index: 1, kind: input, shape index: {}]   ;;  %s673_s0 = inlined_call_operand.vmem [shape: f32[2,8], index: 0, kind: input, shape index: {}]   ;;  %s674_s3 = inlined_call_operand.vmem [shape: f32[128,128], index: 3, kind: input, shape index: {}]   ;;  %s675_s5 = inlined_call_operand.vmem [shape: f32[128,8], index: 5, kind: input, shape index: {}]   ;;  %s676_s2 = inlined_call_operand.vmem [shape: f32[1,128], index: 2, kind: input, shape index: {}]   ;;  %s677_s4 = inlined_call_operand.vmem [shape: f32[1,128], index: 4, kind: input, shape index: {}]   ;;  %s678_s6 = inlined_call_operand.vmem [shape: f32[1,8], index: 6, kind: input, shape index: {}]   ;;  %s679_s7 = inlined_call_operand.vmem [shape: f32[2,8], index: 7, kind: output, shape index: {}]  }
   0x1   :  { %367 = vmatprep.subr.mxu0 %v499_v0  ;;  %v27_v1 = vld [vmem:[%s672_s1] sm:$0xff]  ;;  %369 = vmatprep.mubr.msk.f32.mxu0 %vm500_vm1, %v499_v0  ;;  %v111_v5 = vld [vmem:[%s674_s3 + $0x8] sm:$0xff]  ;;  %v112_v6 = vld [vmem:[%s674_s3 + $0x10] sm:$0xff]  ;;  %vm321_vm5 = vcmask 58368  }
   0x2   :  { %v26_v2 = vld [vmem:[%s673_s0] sm:$0x3]  ;;  %368 = vmatpush3.msra.mxu0 %v27_v1  ;;  %442 = vmatprep.subr.bf16.mxu1 %v501_v4  ;;  %v113_v7 = vld [vmem:[%s674_s3 + $0x18] sm:$0xff]  ;;  %v115_v11 = vld [vmem:[%s674_s3 + $0x28] sm:$0xff] }
   0x3   :  { %v110_v3 = vld [vmem:[%s674_s3] sm:$0xff]  ;;  %370 = vmatmul.mubr.msk.f32.vlgmr.msra.gmra.mrb[0].mxu0 %vm35_vm0, %v26_v2  ;;  %404 = vmatprep.mubr.msk.f32.mxu1 %vm500_vm1, %v499_v0  ;;  %v446_v9 = vpack.c.bf16 %v113_v7, %v112_v6  ;;  %v116_v13 = vld [vmem:[%s674_s3 + $0x30] sm:$0xff]  ;;  %v117_v14 = vld [vmem:[%s674_s3 + $0x38] sm:$0xff] }
   0x4   :  { %v443_v8 = vpack.c.bf16 %v111_v5, %v110_v3  ;;  %466 = vmatprep.subr.bf16.mxu0 %v501_v4  ;;  %439 = vmatprep.mubr.msk.f32.mxu0 %vm500_vm1, %v499_v0  ;;  %v114_v10 = vld [vmem:[%s674_s3 + $0x20] sm:$0xff]  ;;  %v452_v15 = vpack.c.bf16 %v117_v14, %v116_v13  ;;  %v119_v17 = vld [vmem:[%s674_s3 + $0x48] sm:$0xff]  ;;  %v120_v19 = vld [vmem:[%s674_s3 + $0x50] sm:$0xff] }
   0x5   :  { %v449_v12 = vpack.c.bf16 %v115_v11, %v114_v10  ;;  %v118_v16 = vld [vmem:[%s674_s3 + $0x40] sm:$0xff]  ;;  %v121_v20 = vld [vmem:[%s674_s3 + $0x58] sm:$0xff]  ;;  %v123_v23 = vld [vmem:[%s674_s3 + $0x68] sm:$0xff]  ;;  %v317_v10 = vlaneseq }
   0x6   :  { %444 = vmatpush3.bf16.msra.mxu1 %v443_v8  ;;  %v455_v18 = vpack.c.bf16 %v119_v17, %v118_v16  ;;  %v458_v21 = vpack.c.bf16 %v121_v20, %v120_v19  ;;  %v122_v22 = vld [vmem:[%s674_s3 + $0x60] sm:$0xff]  ;;  %v124_v25 = vld [vmem:[%s674_s3 + $0x70] sm:$0xff]  ;;  %v125_v26 = vld [vmem:[%s674_s3 + $0x78] sm:$0xff] }
   0x7   :  { %445 = vmatprep.subr.bf16.mxu1 %v501_v4  ;;  %v461_v24 = vpack.c.bf16 %v123_v23, %v122_v22  ;;  %v464_v27 = vpack.c.bf16 %v125_v26, %v124_v25  ;;  %v204_v28 = vld [vmem:[%s675_s5] sm:$0xff]  ;;  %v205_v29 = vld [vmem:[%s675_s5 + $0x8] sm:$0xff]  ;;  %v206_v30 = vld [vmem:[%s675_s5 + $0x10] sm:$0xff] }
   0x8   :  { %v467_v31 = vpack.c.bf16 %v205_v29, %v204_v28  ;;  %v207_v32 = vld [vmem:[%s675_s5 + $0x18] sm:$0xff]  ;;  %v208_v34 = vld [vmem:[%s675_s5 + $0x20] sm:$0xff]  ;;  %v209_v35 = vld [vmem:[%s675_s5 + $0x28] sm:$0xff] }
   0x9   :  { %v470_v33 = vpack.c.bf16 %v207_v32, %v206_v30  ;;  %v473_v36 = vpack.c.bf16 %v209_v35, %v208_v34  ;;  %v210_v37 = vld [vmem:[%s675_s5 + $0x30] sm:$0xff]  ;;  %v211_v38 = vld [vmem:[%s675_s5 + $0x38] sm:$0xff]  ;;  %v212_v40 = vld [vmem:[%s675_s5 + $0x40] sm:$0xff] }
   0xa   :  { %447 = vmatpush3.bf16.msra.mxu1 %v446_v9  ;;  %468 = vmatpush3.bf16.msra.mxu0 %v467_v31  ;;  %v476_v39 = vpack.c.bf16 %v211_v38, %v210_v37  ;;  %v213_v41 = vld [vmem:[%s675_s5 + $0x48] sm:$0xff]  ;;  %v214_v43 = vld [vmem:[%s675_s5 + $0x50] sm:$0xff]  ;;  %v215_v44 = vld [vmem:[%s675_s5 + $0x58] sm:$0xff] }
   0xb   :  { %448 = vmatprep.subr.bf16.mxu1 %v501_v4  ;;  %469 = vmatprep.subr.bf16.mxu0 %v501_v4  ;;  %v479_v42 = vpack.c.bf16 %v213_v41, %v212_v40  ;;  %v482_v45 = vpack.c.bf16 %v215_v44, %v214_v43  ;;  %v216_v46 = vld [vmem:[%s675_s5 + $0x60] sm:$0xff]  ;;  %v217_v47 = vld [vmem:[%s675_s5 + $0x68] sm:$0xff]  ;;  %v218_v54 = vld [vmem:[%s675_s5 + $0x70] sm:$0xff] }
   0xc   :  { %v485_v48 = vpack.c.bf16 %v217_v47, %v216_v46  ;;  %v327_v49 = vld [vmem:[%s676_s2] ss:$0 sm:$0xff]  ;;  %v219_v55 = vld [vmem:[%s675_s5 + $0x78] sm:$0xff] }
   0xd   :  { %v488_v56 = vpack.c.bf16 %v219_v55, %v218_v54  ;;  %v329_v57 = vld [vmem:[%s677_s4] ss:$0 sm:$0xff] }
   0xe   :  { %450 = vmatpush3.bf16.msra.mxu1 %v449_v12  ;;  %471 = vmatpush3.bf16.msra.mxu0 %v470_v33  ;;  %v330_v62 = vld [vmem:[%s678_s6] ss:$0 sm:$0xff] }
   0xf   :  { %451 = vmatprep.subr.bf16.mxu1 %v501_v4  ;;  %472 = vmatprep.subr.bf16.mxu0 %v501_v4 }
  0x12   :  { %453 = vmatpush3.bf16.msra.mxu1 %v452_v15  ;;  %474 = vmatpush3.bf16.msra.mxu0 %v473_v36  ;;  %v318_v15 = vand.u32 127, %v317_v10 }
  0x13   :  { %454 = vmatprep.subr.bf16.mxu1 %v501_v4  ;;  %475 = vmatprep.subr.bf16.mxu0 %v501_v4 }
  0x14   :  { %vm319_vm4 = vcmp.lt.s32.totalorder %v318_v15, 4 }
  0x16   :  { %456 = vmatpush3.bf16.msra.mxu1 %v455_v18  ;;  %477 = vmatpush3.bf16.msra.mxu0 %v476_v39 }
  0x17   :  { %457 = vmatprep.subr.bf16.mxu1 %v501_v4  ;;  %478 = vmatprep.subr.bf16.mxu0 %v501_v4 }
  0x1a   :  { %459 = vmatpush3.bf16.msra.mxu1 %v458_v21  ;;  %480 = vmatpush3.bf16.msra.mxu0 %v479_v42 }
  0x1b   :  { %460 = vmatprep.subr.bf16.mxu1 %v501_v4  ;;  %481 = vmatprep.subr.bf16.mxu0 %v501_v4 }
  0x1e   :  { %462 = vmatpush3.bf16.msra.mxu1 %v461_v24  ;;  %483 = vmatpush3.bf16.msra.mxu0 %v482_v45 }
  0x1f   :  { %463 = vmatprep.subr.bf16.mxu1 %v501_v4  ;;  %484 = vmatprep.subr.bf16.mxu0 %v501_v4 }
  0x22   :  { %465 = vmatpush3.bf16.msra.mxu1 %v464_v27  ;;  %486 = vmatpush3.bf16.msra.mxu0 %v485_v48 }
  0x23   :  { %487 = vmatprep.subr.bf16.mxu0 %v501_v4 }
  0x26   :  { %489 = vmatpush3.bf16.msra.mxu0 %v488_v56 }
  0xd6   :  { %v105_v50 = vpop.f32.mrb[0].mxu0 }
  0xd7   :  { %v106_v51 = vadd.f32 %v327_v49, %v105_v50  ;;  %v371_v52 = vpop.f32.mrb[1].mxu0 }
  0xd9   :  { %v109_v53 = vmax.f32 %v106_v51, 0.0 }
  0xdb   :  { %405 = vmatmul.mubr.f32.vlgmr.msra.gmra.mrb[0].mxu1 %v109_v53 }
 0x1ae   :  { %v199_v58 = vpop.f32.mrb[0].mxu1 }
 0x1af   :  { %v200_v59 = vadd.f32 %v329_v57, %v199_v58  ;;  %v406_v60 = vpop.f32.mrb[1].mxu1 }
 0x1b1   :  { %v203_v61 = vmax.f32 %v200_v59, 0.0 }
 0x1b3   :  { %440 = vmatmul.mubr.f32.vlgmr.msra.gmra.mrb[2].mxu0 %v203_v61 }
 0x286   :  { %v293_v63 = vpop.f32.mrb[2].mxu0 }
 0x287   :  { %v294_v0 = vadd.f32 %v330_v62, %v293_v63  ;;  %v441_v1 = vpop.f32.mrb[3].mxu0 }
 0x289   :  { %v301_v2 = vand.u32 2147483647, %v294_v0  ;;  %v298_v14 = vmax.f32 %v294_v0, 0.0  ;;  %vm299_vm3 = vcmp.ne.f32.partialorder %v294_v0, %v294_v0 }
 0x28b   :  { %v302_v3 = vsub.f32 0.0, %v301_v2 }
 0x28d   :  { %v303_v4 = vmul.f32 1.442695, %v302_v3 }
 0x28f   :  { %493 = vpow2.f32 %v303_v4 }
 0x299   :  { %v494_v5 = vpop.eup %493 }
 0x29a   :  { %v305_v6 = vadd.f32 1.0, %v494_v5  ;;  %v308_v7 = vmul.f32 -0.5, %v494_v5  ;;  %v311_v9 = vand.u32 2147483647, %v494_v5 }
 0x29c   :  { %495 = vlog2.f32 %v305_v6  ;;  %v309_v8 = vadd.f32 1.0, %v308_v7  ;;  %vm312_vm2 = vcmp.lt.f32.partialorder %v311_v9, 0.0004427343 }
 0x29d   :  { %497 = vtanh.f32 %v294_v0 }
 0x29e   :  { %v310_v13 = vmul.f32 %v494_v5, %v309_v8 }
 0x2a6   :  { %v496_v11 = vpop.eup %495 }
 0x2a7   :  { %v307_v12 = vmul.f32 0.6931472, %v496_v11  ;;  %v498_v20 = vpop.eup %497 }
 0x2a9   :  { %v313_v16 = vsel %vm312_vm2, %v310_v13, %v307_v12 }
 0x2aa   :  { %v314_v17 = vadd.f32 %v313_v16, %v298_v14 }
 0x2ac   :  { %v315_v18 = vsel %vm299_vm3, %v294_v0, %v314_v17 }
 0x2ad   :  { %v316_v19 = vmax.f32 %v315_v18, 1e-10 }
 0x2af   :  { %v320_v21 = vsel %vm319_vm4, %v498_v20, %v316_v19 }
 0x2b0   :  { %322 = vst.msk [vmem:[%s679_s7] sm:$0x3] %vm321_vm5, %v320_v21 }

</bundles_post_ra>
